<compile_context>
chip_gen: v6e
topology: v6e:2x2x1
jax: 0.10.0
libtpu: 0.0.40
codegen_flags: <defaults>
</compile_context>

<pallas_src>
import functools

import jax
import jax.numpy as jnp
from jax.experimental import pallas as pl
from jax.experimental.pallas import tpu as pltpu


def _qrmsnorm_kernel(x_ref, w_ref, o_ref, *, eps, inv_h, use_mxu_reduce):
    # x_ref: (TR, H) block of hidden_states
    # w_ref: (1, H) weight row, already f32 and pre-divided by output_scale
    x = x_ref[...].astype(jnp.float32)
    x2 = x * x
    if use_mxu_reduce:
        # Route the H-reduction through the idle MXU: (TR,H) @ (H,128) gives
        # the per-row sum replicated across 128 lanes; take lane 0.  Saves the
        # ~1 VPU add/element the cross-vreg reduction costs (v7x VALU-bound).
        ones = jnp.ones((x.shape[-1], 128), jnp.float32)
        sums = jnp.dot(x2, ones, preferred_element_type=jnp.float32)
        variance = sums[:, 0:1] * inv_h
    else:
        # Narrow hidden dims: plain VPU/XLU reduction.
        variance = jnp.sum(x2, axis=-1, keepdims=True) * inv_h
    normed = x * jax.lax.rsqrt(variance + eps)
    y = w_ref[...] * normed
    # round-half-to-even, same as torch.round
    q = jnp.clip(jnp.round(y), -128.0, 127.0)
    o_ref[...] = q.astype(jnp.int8)


def _vmem_capacity_bytes():
    """Per-TensorCore VMEM capacity; conservative (v7x) fallback."""
    try:
        info = pltpu.get_tpu_info()
        cap = int(getattr(info, "vmem_capacity_bytes", 0) or 0)
        if cap > 0:
            return cap
    except Exception:
        pass
    return 64 * 1024 * 1024


def _vmem_limit_bytes(vmem_capacity):
    # Leave ~25% headroom for compiler scratch; 48 MiB on v7x (64 MiB parts),
    # 96 MiB on v5e/v6e (128 MiB parts).
    return int(min(vmem_capacity * 3 // 4, 100 * 1024 * 1024))


def _choose_row_tile(rows, H, in_itemsize, vmem_capacity):
    """Pick the largest VMEM-safe row tile (multiple of 32 for int8 tiling)."""
    # Full per-row footprint: double-buffered input + double-buffered int8
    # output + ~3 full-tile f32 intermediates (cast, x*x / normed, y).
    bytes_per_row = H * (2 * in_itemsize + 2 * 1 + 12)
    budget = min(int(vmem_capacity * 0.55), 64 * 1024 * 1024)
    tile = budget // max(bytes_per_row, 1)
    tile = max(32, (tile // 32) * 32)
    # Megacore (v7x, 2 TCs): request at least 2 grid steps so the parallel
    # row axis can split across cores; costs one ~0.35us step on single-TC
    # v5e/v6e, which is negligible.
    if rows >= 64:
        half = ((rows + 1) // 2 + 31) // 32 * 32
        tile = min(tile, max(32, half))
    # Never exceed the (32-rounded-up) row count.
    tile = min(tile, (rows + 31) // 32 * 32)
    return max(tile, 32)


def qjamba_rmsnorm(hidden_states, weight, *, variance_epsilon, output_scale,
                   row_tile=None):
    """RMSNorm + int8 output quantization.

    hidden_states: (..., H) any float dtype
    weight:        (H,)
    returns:       (..., H) int8
    """
    orig_shape = hidden_states.shape
    H = orig_shape[-1]
    x2d = hidden_states.reshape(-1, H)
    rows = x2d.shape[0]
    in_itemsize = x2d.dtype.itemsize

    vmem_cap = _vmem_capacity_bytes()
    if row_tile is None:
        row_tile = _choose_row_tile(rows, H, in_itemsize, vmem_cap)

    # Ragged last block handled by Pallas (masked stores); no pad/slice copies.
    grid = pl.cdiv(rows, row_tile)

    # Fold output_scale into the (H,) weight once in the wrapper: removes the
    # per-element divide (0.05 has no exact f32 reciprocal, so the compiler
    # cannot strength-reduce it inside the kernel).  Documented +/-1 LSB vs the
    # y/scale formulation at exact .5 rounding boundaries.
    w2d = (weight.astype(jnp.float32) / jnp.float32(output_scale)).reshape(1, H)

    # MXU reduction only when H is wide enough for it to pay off and lane-aligned.
    use_mxu_reduce = (H % 128 == 0) and (H >= 256)

    kernel = functools.partial(
        _qrmsnorm_kernel,
        eps=float(variance_epsilon),
        inv_h=float(1.0 / H),
        use_mxu_reduce=use_mxu_reduce,
    )

    cost = pl.CostEstimate(
        flops=int(rows) * int(H) * 9,
        transcendentals=int(rows),
        bytes_accessed=int(rows) * int(H) * (in_itemsize + 1) + int(H) * 4,
    )

    out2d = pl.pallas_call(
        kernel,
        out_shape=jax.ShapeDtypeStruct((rows, H), jnp.int8),
        grid_spec=pltpu.PrefetchScalarGridSpec(
            num_scalar_prefetch=0,
            grid=(grid,),
            in_specs=[
                pl.BlockSpec((row_tile, H), lambda i: (i, 0)),
                pl.BlockSpec((1, H), lambda i: (0, 0)),
            ],
            out_specs=pl.BlockSpec((row_tile, H), lambda i: (i, 0)),
        ),
        compiler_params=pltpu.CompilerParams(
            dimension_semantics=("parallel",),
            vmem_limit_bytes=_vmem_limit_bytes(vmem_cap),
        ),
        cost_estimate=cost,
    )(x2d, w2d)

    return out2d.reshape(orig_shape)


def _reference(hidden_states, weight, eps, output_scale):
    x = hidden_states.astype(jnp.float32)
    var = jnp.mean(x * x, axis=-1, keepdims=True)
    y = weight.astype(jnp.float32) * (x * jax.lax.rsqrt(var + eps))
    q = jnp.clip(jnp.round(y / output_scale), -128, 127)
    return q.astype(jnp.int8)


if __name__ == "__main__":
    eps = 1e-6
    output_scale = 0.05
    key = jax.random.PRNGKey(0)
    k1, k2, k3, k4, k5 = jax.random.split(key, 5)

    # Case 1: (batch=2, seq=32, hidden=128) bf16 — rows=64 forces a 2-step grid
    # (megacore split path) and the VPU reduction path (H < 256).
    B, S, H = 2, 32, 128
    x = jax.random.normal(k1, (B, S, H), dtype=jnp.bfloat16)
    weight = 1.0 + 0.01 * jax.random.normal(k2, (H,), dtype=jnp.float32)
    out = jax.block_until_ready(
        qjamba_rmsnorm(x, weight, variance_epsilon=eps, output_scale=output_scale))
    ref = _reference(x, weight, eps, output_scale)
    assert out.shape == (B, S, H)
    assert out.dtype == jnp.int8
    # Folding output_scale into the weight can flip values exactly on a .5
    # rounding boundary by one LSB vs the y/scale formulation.
    assert jnp.max(jnp.abs(out.astype(jnp.int32) - ref.astype(jnp.int32))) <= 1

    # Case 2: rows (21) not a multiple of the tile and wide hidden (512):
    # exercises the ragged last block (no pad/slice) and the MXU reduction path.
    H2 = 512
    x2 = jax.random.normal(k3, (3, 7, H2), dtype=jnp.bfloat16)
    w2 = 1.0 + 0.01 * jax.random.normal(k4, (H2,), dtype=jnp.float32)
    out2 = jax.block_until_ready(
        qjamba_rmsnorm(x2, w2, variance_epsilon=eps, output_scale=output_scale))
    ref2 = _reference(x2, w2, eps, output_scale)
    assert out2.shape == (3, 7, H2)
    assert jnp.max(jnp.abs(out2.astype(jnp.int32) - ref2.astype(jnp.int32))) <= 1

    # Case 3: f32 input, multi-step grid with a partial last block (rows=200,
    # tile=128 -> blocks of 128 and 72).
    x3 = jax.random.normal(k5, (4, 50, H), dtype=jnp.float32)
    out3 = jax.block_until_ready(
        qjamba_rmsnorm(x3, weight, variance_epsilon=eps, output_scale=output_scale))
    ref3 = _reference(x3, weight, eps, output_scale)
    assert out3.shape == (4, 50, H)
    assert jnp.max(jnp.abs(out3.astype(jnp.int32) - ref3.astype(jnp.int32))) <= 1

    print("KERNEL_OK")
</pallas_src>

<mosaic_0001>
module attributes {stable_mosaic.version = 11 : i64} {
  func.func @_qrmsnorm_kernel(%arg0: i32, %arg1: memref<32x128xbf16, #tpu.memory_space<vmem>>, %arg2: memref<1x128xf32, #tpu.memory_space<vmem>>, %arg3: memref<32x128xi8, #tpu.memory_space<vmem>>) attributes {dimension_semantics = [#tpu.dimension_semantics<parallel>], iteration_bounds = array<i64: 2>, scalar_prefetch = 0 : i64, scratch_operands = 0 : i64, tpu.core_type = #tpu.core_type<tc>, window_params = [{transform_indices = @transform_0, window_bounds = array<i64: 32, 128>}, {pipeline_mode = #tpu.pipeline_mode<synchronous>, transform_indices = @transform_1, window_bounds = array<i64: 1, 128>}, {transform_indices = @transform_2, window_bounds = array<i64: 32, 128>}]} {
    %c0 = arith.constant 0 : index
    %c0_0 = arith.constant 0 : index
    %0 = vector.load %arg1[%c0, %c0_0] : memref<32x128xbf16, #tpu.memory_space<vmem>>, vector<32x128xbf16>
    %1 = arith.extf %0 : vector<32x128xbf16> to vector<32x128xf32>
    %2 = arith.mulf %1, %1 : vector<32x128xf32>
    %cst = arith.constant dense<0.000000e+00> : vector<32xf32>
    %3 = vector.multi_reduction <add>, %2, %cst [1] : vector<32x128xf32> to vector<32xf32>
    %4 = vector.shape_cast %3 : vector<32xf32> to vector<32x1xf32>
    %cst_1 = arith.constant 7.812500e-03 : f32
    %5 = vector.broadcast %cst_1 : f32 to vector<32x1xf32>
    %6 = arith.mulf %4, %5 : vector<32x1xf32>
    %cst_2 = arith.constant 9.99999997E-7 : f32
    %7 = vector.broadcast %cst_2 : f32 to vector<32x1xf32>
    %8 = arith.addf %6, %7 : vector<32x1xf32>
    %9 = math.rsqrt %8 : vector<32x1xf32>
    %10 = vector.broadcast %9 : vector<32x1xf32> to vector<32x128xf32>
    %11 = arith.mulf %1, %10 : vector<32x128xf32>
    %c0_3 = arith.constant 0 : index
    %c0_4 = arith.constant 0 : index
    %12 = vector.load %arg2[%c0_3, %c0_4] : memref<1x128xf32, #tpu.memory_space<vmem>>, vector<1x128xf32>
    %13 = vector.broadcast %12 : vector<1x128xf32> to vector<32x128xf32>
    %14 = arith.mulf %13, %11 : vector<32x128xf32>
    %15 = math.roundeven %14 : vector<32x128xf32>
    %cst_5 = arith.constant -1.280000e+02 : f32
    %cst_6 = arith.constant 1.270000e+02 : f32
    %16 = vector.broadcast %cst_5 : f32 to vector<32x128xf32>
    %17 = arith.maximumf %16, %15 : vector<32x128xf32>
    %18 = vector.broadcast %cst_6 : f32 to vector<32x128xf32>
    %19 = arith.minimumf %18, %17 : vector<32x128xf32>
    %20 = arith.fptosi %19 : vector<32x128xf32> to vector<32x128xi8>
    %c0_7 = arith.constant 0 : index
    %c0_8 = arith.constant 0 : index
    %21 = vector.load %arg3[%c0_7, %c0_8] : memref<32x128xi8, #tpu.memory_space<vmem>>, vector<32x128xi8>
    tpu.vector_store %arg3[%c0_7, %c0_8], %20 {strides = array<i32>} : memref<32x128xi8, #tpu.memory_space<vmem>>, vector<32x128xi8>,
    return
  }
  func.func @transform_0(%arg0: i32) -> (i32, i32) {
    %c0_i32 = arith.constant 0 : i32
    %c0_i32_0 = arith.constant 0 : i32
    return %arg0, %c0_i32 : i32, i32
  }
  func.func @transform_1(%arg0: i32) -> (i32, i32) {
    %c0_i32 = arith.constant 0 : i32
    %c0_i32_0 = arith.constant 0 : i32
    %c0_i32_1 = arith.constant 0 : i32
    return %c0_i32, %c0_i32_0 : i32, i32
  }
  func.func @transform_2(%arg0: i32) -> (i32, i32) {
    %c0_i32 = arith.constant 0 : i32
    %c0_i32_0 = arith.constant 0 : i32
    return %arg0, %c0_i32 : i32, i32
  }
}

</mosaic_0001>

<bundles_post_ra>
// kernel: tpu_custom_call.1
= control target key start
LH: loop header
LB: loop body
LE: loop exit
PB: predicated region body
PF: predicated region fallthrough
CT: control target
= control target key end

     0   :  { %7 = vsyncpa [#allocation3], 0  ;;  %s683_s0 = inlined_call_operand.hbm [shape: bf16[64,128], index: 0, kind: input, shape index: {}]   ;;  %s684_s1 = inlined_call_operand.vmem [shape: f32[1,128], index: 1, kind: input, shape index: {}]   ;;  %s685_s2 = inlined_call_operand.hbm [shape: s8[64,128], index: 2, kind: output, shape index: {}]  }
   0x1   :  { %9 = vsyncpa [#allocation3 + $0x1], 0 }
   0x2   :  { %10 = vsyncpa [#allocation4], 0 }
   0x3   :  { %12 = vsyncpa [#allocation4 + $0x1], 0  ;;  %s539_s9 = smov 0   ;;  %s541_s10 = smov 0  }
   0x4   :  { %s543_s11 = smov 0   ;;  %s545_s12 = smov 0  }
   0x5 LB: > { %s560_s13 = sadd.s32 4294967295, %s518_s12   ;;  %s322_s14 = sadd.s32 4294967294, %s518_s12   ;;  %s518_s12 = sphi %s545_s12, %s700_s12   ;;  %s514_s11 = sphi %s543_s11, %s699_s11   ;;  %s510_s10 = sphi %s541_s10, %s698_s10   ;;  %s506_s9 = sphi %s539_s9, %s697_s9  }
   0x6   : > { %s564_s15 = sadd.s32 1, %s518_s12   ;;  %s25_s16 = sadd.s32 1, %s514_s11 }
   0x7   : > { %s22_s17 = ssub.s32 %s518_s12, %s564_s15  ;;  %p32_p0 = scmp.ne.s32.totalorder %s514_s11, %s510_s10 }
   0x8   : > { %p23_p1 = scmp.eq.s32.totalorder %s22_s17, 0  ;;  %p33_p2 = scmp.eq.s32.totalorder %s518_s12, 0 }
   0x9   : > { %p38_p3 = scmp.ne.s32.totalorder %s510_s10, %s506_s9  ;;  %p39_p4 = scmp.eq.s32.totalorder %s560_s13, 0 }
   0xa   : > { %s576_s18 = scalar_select %p23_p1, %s514_s11, %s25_s16  }
   0xb   : > { %p578_p5 = por %p33_p2, %p32_p0  ;;  %p582_p6 = por %p39_p4, %p38_p3 }
   0xc   : > { %p83_p7 = scmp.eq.s32.totalorder %s560_s13, 1  ;;  %p89_p8 = scmp.eq.s32.totalorder %s322_s14, 1 }
   0xd   : > { %s689_s20 = scalar_select %p582_p6, 1, 0 }
   0xe   : > { %p382_p10 = scmp.lt.s32.totalorder %s518_s12, 2  ;;  %p589_p11 = por %p83_p7, %p32_p0 }
   0xf   : > { %p593_p12 = por %p89_p8, %p38_p3  ;;  %s112_s23 = sand.u32 1, %s514_s11  }
  0x10   : > { %s690_s21 = scalar_select %p589_p11, 1, 0 }
  0x11   : > { %s691_s22 = scalar_select %p593_p12, 1, 0 }
  0x12   : > { %s348_s24 = sshll.u32 %s518_s12, 8  ;;  %s325_s25 = sshll.u32 %s112_s23, 4 }
  0x13   : > { %s602_s28 = scalar_lea.hbm %s683_s0, %s348_s24  ;;  %s116_s29 = scalar_lea.vmem [#allocation2], %s325_s25 }
  0x14   : > { %s123_s30 = sshll.u32 %s116_s29, 4  ;;  %p606_p13 = pnand %p382_p10, %p578_p5  ;;  %s610_s30 = int_to_ptr.vmem [resolvable:$true] %s123_s30 }
  0x15   : > { %s612_s4 = scalar_lea.sflag [#allocation3], %s112_s23  ;;  %s426_s5 = scalar_lea.hbm %s602_s28, 256 }
  0x16   : > { %p427_p0 = scmp.ne.s32.totalorder %s602_s28, %s426_s5  ;;  %p428_p1 = pneg %p606_p13 }
  0x17   : > { %s431_s8 = scalar_lea.hbm %s683_s0, 512  ;;  %p432_p4 = scmp.lt.s32.totalorder %s602_s28, %s683_s0 }
  0x18   : > { %p429_p2 = pnand %p428_p1, %p427_p0  ;;  %p433_p5 = scmp.lt.s32.totalorder %s431_s8, %s426_s5 }
  0x1a   : > { %p430_p3 = pneg %p429_p2  ;;  %p434_p7 = por %p433_p5, %p432_p4 }
  0x1c   : > { %p435_p8 = pnand %p434_p7, %p430_p3 }
  0x1e   : > { %438 = shalt.err (!%p435_p8)
}
  0x1f   : > { %s439_s17 = scalar_lea.vmem %s610_s30, 256  ;;  %s520_s19 = smov [#allocation2]  }
  0x20   : > { %p440_p10 = scmp.ne.s32.totalorder %s610_s30, %s439_s17  ;;  %s444_s23 = sshll.u32 %s520_s19, 4  ;;  %s445_s23 = int_to_ptr.vmem [resolvable:$false] %s444_s23 }
  0x21   : > { %s446_s24 = scalar_lea.vmem %s445_s23, 512  ;;  %p447_p2 = scmp.lt.s32.totalorder %s610_s30, %s445_s23 }
  0x22   : > { %p442_p9 = pnand %p440_p10, %p428_p1  ;;  %p448_p12 = scmp.lt.s32.totalorder %s446_s24, %s439_s17 }
  0x24   : > { %p443_p0 = pneg %p442_p9  ;;  %p449_p11 = por %p448_p12, %p447_p2 }
  0x26   : > { %p450_p6 = pnand %p449_p11, %p443_p0 }
  0x28   : > { %453 = shalt.err (!%p450_p6)
}
  0x29   : > { %s521_s25 = smov 64   ;;  %s522_s26 = smov 4  }
  0x2a   : > { %377 = dma.hbm_to_vmem [thread:$0]  (!%p606_p13), %s602_s28, 256, %s610_s30, %s612_s4, %s521_s25, %s521_s25, %s522_s26  }
  0x2b   : > { %p328_p9 = scmp.ge.s32.totalorder %s518_s12, 1  ;;  %p131_p1 = scmp.lt.s32.totalorder %s518_s12, 3 }
  0x2d   : > { %p132_p3 = pnand %p328_p9, %p131_p1 }
  0x2e   : > { %s636_s27 = sand.u32 (!%p132_p3), 1, %s510_s10   ;;  %p693_p6 = scmp.ne.s32.totalorder (!%p132_p3), %s689_s20, 0 }
  0x2f   : > { %135 = sbr.rel (%p132_p3) target bundleno = 244 (0xf4), region = 28  ;;  %s329_s29 = sshll.u32 (!%p132_p3), %s636_s27, 4 }
  0x30   : > { %s138_s5 = scalar_lea.sflag (!%p132_p3), [#allocation3], %s636_s27  ;;  %s141_s6 = scalar_lea.vmem (!%p132_p3), [#allocation2], %s329_s29 }
  0x34   : > { %497 = dma.done.wait (%p693_p6), %s138_s5, 256  }
  0x35   : > { %499 = vsyncadd (%p693_p6), %s138_s5, 4294967040  ;;  %v357_v0 = vld [vmem:[%s141_s6 + $0x8] sm:$0xff]   ;;  %v350_v1 = vld [vmem:[%s141_s6] sm:$0xff]   ;;  %s330_s30 = sshll.u32 %s636_s27, 3  ;;  %s345_s3 = sshll.u32 %s560_s13, 7 }
  0x36   : > { %v355_v2 = vunpack.c.l.bf16 %v357_v0  ;;  %v351_v3 = vunpack.c.l.bf16 %v350_v1  ;;  %v356_v4 = vunpack.c.h.bf16 %v357_v0  ;;  %v352_v5 = vunpack.c.h.bf16 %v350_v1  ;;  %v331_v23 = vld [vmem:[%s684_s1] ss:$0 sm:$0xff]  ;;  %s161_s4 = scalar_lea.vmem [#allocation5], %s330_s30  ;;  %s250_s16 = scalar_lea.hbm %s685_s2, %s345_s3 }
  0x37   : > { %s252_s7 = sshll.u32 %s161_s4, 4  ;;  %s239_s17 = scalar_lea.sflag [#allocation4], %s636_s27  ;;  %s253_s7 = int_to_ptr.vmem [resolvable:$true] %s252_s7 }
  0x38   : > { %v173_v6 = vmul.f32 %v355_v2, %v355_v2  ;;  %v171_v7 = vmul.f32 %v351_v3, %v351_v3  ;;  %v174_v8 = vmul.f32 %v356_v4, %v356_v4  ;;  %v172_v9 = vmul.f32 %v352_v5, %v352_v5  ;;  %s454_s19 = scalar_lea.vmem %s253_s7, 128  ;;  %p694_p12 = scmp.ne.s32.totalorder %s690_s21, 0 }
  0x39   : > { %p455_p11 = scmp.ne.s32.totalorder %s253_s7, %s454_s19  ;;  %s523_s23 = smov [#allocation5]  }
  0x3a   : > { %179 = vadd.xlane.f32.xlu1 %v173_v6  ;;  %175 = vadd.xlane.f32.xlu0 %v171_v7  ;;  %s458_s24 = sshll.u32 %s523_s23, 4  ;;  %s459_s24 = int_to_ptr.vmem [resolvable:$false] %s458_s24 }
  0x3b   : > { %p456_p13 = pnand %p455_p11, %p694_p12  ;;  %s460_s13 = scalar_lea.vmem %s459_s24, 256 }
  0x3c   : > { %p461_p5 = scmp.lt.s32.totalorder %s253_s7, %s459_s24  ;;  %p462_p7 = scmp.lt.s32.totalorder %s460_s13, %s454_s19 }
  0x3d   : > { %p457_p4 = pneg %p456_p13 }
  0x3e   : > { %181 = vadd.xlane.f32.xlu1 %v174_v8  ;;  %177 = vadd.xlane.f32.xlu0 %v172_v9  ;;  %p463_p8 = por %p462_p7, %p461_p5 }
  0x40   : > { %p464_p10 = pnand %p463_p8, %p457_p4 }
  0xc3   : > { %v180_v10 = vpop.xlane.xlu1 %179  ;;  %v176_v11 = vpop.xlane.xlu0 %175 }
  0xc4   : > { %v185_v12 = vmul.f32 0.0078125, %v180_v10  ;;  %v183_v13 = vmul.f32 0.0078125, %v176_v11 }
  0xc6   : > { %v189_v14 = vadd.f32 1e-06, %v185_v12  ;;  %v187_v15 = vadd.f32 1e-06, %v183_v13 }
  0xc7   : > { %v182_v16 = vpop.xlane.xlu1 %181  ;;  %v178_v17 = vpop.xlane.xlu0 %177 }
  0xc8   : > { %418 = vrsqrt.f32 %v189_v14  ;;  %v186_v18 = vmul.f32 0.0078125, %v182_v16  ;;  %v184_v19 = vmul.f32 0.0078125, %v178_v17 }
  0xc9   : > { %420 = vrsqrt.f32 %v187_v15 }
  0xca   : > { %v190_v20 = vadd.f32 1e-06, %v186_v18  ;;  %v188_v21 = vadd.f32 1e-06, %v184_v19 }
  0xcc   : > { %422 = vrsqrt.f32 %v190_v20 }
  0xcd   : > { %424 = vrsqrt.f32 %v188_v21 }
  0xd5   : > { %v419_v22 = vpop.eup %418 }
  0xd6   : > { %v421_v24 = vpop.eup %420  ;;  %v197_v25 = vmul.f32 %v419_v22, %v355_v2 }
  0xd7   : > { %v195_v26 = vmul.f32 %v421_v24, %v351_v3 }
  0xd8   : > { %v208_v27 = vmul.f32 %v331_v23, %v197_v25 }
  0xd9   : > { %v423_v28 = vpop.eup %422  ;;  %v206_v29 = vmul.f32 %v331_v23, %v195_v26 }
  0xda   : > { %v425_v30 = vpop.eup %424  ;;  %v198_v31 = vmul.f32 %v423_v28, %v356_v4  ;;  %v340_v34 = vclampa-f32 %v208_v27, -128, 127 }
  0xdb   : > { %v196_v32 = vmul.f32 %v425_v30, %v352_v5  ;;  %v336_v36 = vclampa-f32 %v206_v29, -128, 127 }
  0xdc   : > { %v209_v33 = vmul.f32 %v331_v23, %v198_v31  ;;  %v366_v39 = vcvt.f32.s32 %v340_v34 }
  0xdd   : > { %v207_v35 = vmul.f32 %v331_v23, %v196_v32  ;;  %v360_v41 = vcvt.f32.s32 %v336_v36 }
  0xde   : > { %v342_v37 = vclampa-f32 %v209_v33, -128, 127 }
  0xdf   : > { %v338_v38 = vclampa-f32 %v207_v35, -128, 127 }
  0xe0   : > { %v369_v40 = vcvt.f32.s32 %v342_v37 }
  0xe1   : > { %v363_v42 = vcvt.f32.s32 %v338_v38 }
  0xe2   : > { %v235_v43 = vpack.c.b16 %v369_v40, %v366_v39 }
  0xe3   : > { %v234_v44 = vpack.c.b16 %v363_v42, %v360_v41 }
  0xe5   : > { %v236_v45 = vpack.c.b8 %v235_v43, %v234_v44 }
  0xe7   : > { %237 = vst [vmem:[%s161_s4] sm:$0xff] %v236_v45 }
  0xe8   : > { %467 = shalt.err (!%p464_p10)
}
  0xe9   : > { %s468_s25 = scalar_lea.hbm %s250_s16, 128  ;;  %s472_s29 = scalar_lea.hbm %s685_s2, 256 }
  0xea   : > { %p469_p0 = scmp.ne.s32.totalorder %s250_s16, %s468_s25  ;;  %p473_p1 = scmp.lt.s32.totalorder %s250_s16, %s685_s2 }
  0xeb   : > { %p474_p3 = scmp.lt.s32.totalorder %s472_s29, %s468_s25 }
  0xec   : > { %p470_p2 = pnand %p469_p0, %p694_p12 }
  0xed   : > { %p475_p6 = por %p474_p3, %p473_p1 }
  0xee   : > { %p471_p9 = pneg %p470_p2 }
  0xf0   : > { %p476_p11 = pnand %p475_p6, %p471_p9 }
  0xf2   : > { %479 = shalt.err (!%p476_p11)
}
  0xf3   : > { %372 = dma.vmem_to_hbm [thread:$0]  (%p694_p12), %s253_s7, 128, %s250_s16, %s239_s17  }
  0xf4 PF: > { %s264_s20 = sand.u32 1, %s506_s9   ;;  %p695_p13 = scmp.ne.s32.totalorder %s691_s22, 0 }
  0xf5   : > { %p696_p4 = scmp.ge.s32.totalorder %s518_s12, 2  ;;  %s265_s28 = scalar_lea.sflag [#allocation4], %s264_s20 }
  0xf7   : > { %p379_p5 = pnand %p696_p4, %p695_p13 }
  0xf9   : > { %p380_p7 = pneg %p379_p5 }
  0xfb   : > { %501 = dma.done.wait (%p380_p7), %s265_s28, 128  }
  0xfc   : > { %503 = vsyncadd (%p380_p7), %s265_s28, 4294967168  ;;  %p15_p8 = scmp.ge.s32.totalorder %s564_s15, 4   ;;  %s697_s9 = smov %s510_s10 }
  0xfd   : > { %s698_s10 = smov %s514_s11  ;;  %s699_s11 = smov %s576_s18 }
  0xfe   : > { %s700_s12 = smov %s564_s15  ;;  %17 = sbr.rel (!%p15_p8) target bundleno = 5 (0x5), region = 73 }
 0x103   :  { %270 = vsyncpa [#allocation3], 1 }
 0x104   :  { %272 = vsyncpa [#allocation3 + $0x1], 1 }
 0x105   :  { %273 = vsyncpa [#allocation4], 1 }
 0x106   :  { %275 = vsyncpa [#allocation4 + $0x1], 1 }

</bundles_post_ra>
